<compile_context>
chip_gen: v7x
topology: tpu7x:2x2x1
jax: 0.10.0
libtpu: 0.0.40
codegen_flags: <defaults>
</compile_context>

<pallas_src>
import jax
import jax.numpy as jnp
from jax.experimental import pallas as pl
from jax.experimental.pallas import tpu as pltpu

BN_EPS = 1e-5


def _vmem_limit_bytes(cin, cout, hw):
    """Generous scoped-VMEM estimate: double-buffered blocks + conv temporaries."""
    blocks = (cin + cout + 2) * hw * 4            # pipelined input/output/mask blocks
    temps = (12 * cin + 6 * cout) * hw * 4        # rolled slabs, partials, acc (generous)
    need = 2 * blocks + temps + (4 << 20)
    return int(min(max(need, 24 << 20), 64 << 20))


@jax.jit
def simple_conv2d(x_nchw, conv_w, conv_b, bn_gamma, bn_beta, prelu_a):
    """Forward of SimpleConv2d: Conv2d(3x3, pad=1) -> BatchNorm2d(train) -> PReLU.

    x_nchw: (N, Cin, H, W) f32; conv_w: (Cout, Cin, 3, 3); conv_b: (Cout,)
    (accepted for interface parity but unused: training-mode BN mean
    subtraction cancels a per-channel bias exactly); bn_gamma/bn_beta: (Cout,);
    prelu_a: (1,).  Returns (N, Cout, H, W) f32.
    """
    del conv_b  # exactly cancelled by BN's batch-mean subtraction (training mode)

    N, Cin, H, W = x_nchw.shape
    Cout, _, KH, KW = conv_w.shape
    assert (KH, KW) == (3, 3), "specialised to the module default 3x3 / padding=1"
    HW = H * W
    M = N * HW

    # ---- input prep: metadata-only reshape, no pad / transpose / copy passes
    x3 = x_nchw.reshape(N, Cin, HW)
    # weights as (9, Cout, Cin): w3[kh*3 + kw, o, c] == conv_w[o, c, kh, kw]
    w3 = jnp.transpose(conv_w, (2, 3, 0, 1)).reshape(KH * KW, Cout, Cin)
    # tiny column-validity masks (fetched once per pallas_call, reused per step):
    #   cmask[0, p] = 1 iff w(p) != 0      (kw = 0 taps, dw = -1)
    #   cmask[1, p] = 1 iff w(p) != W - 1  (kw = 2 taps, dw = +1)
    col = jnp.tile(jnp.arange(W, dtype=jnp.int32), H)
    cmask = jnp.stack([col != 0, col != W - 1], axis=0).astype(jnp.float32)

    vmem_limit = _vmem_limit_bytes(Cin, Cout, HW)

    # TODO(synk): for very large H*W, add halo-based row tiling of the per-image
    # blocks so they stay under v7x's 64 MiB VMEM (and enable spatial megacore
    # split when N == 1).
    # TODO(synk): optional bf16 matmul-input path for v6e/v7x MXU (gated flag;
    # slightly different numerics).

    def conv9(x, w_ref, cm_ref):
        """3x3 'same' conv of one image: x (Cin, HW) f32 -> (Cout, HW) f32.

        Shifts via XLU rolls; vertical edges via in-kernel row masks; horizontal
        edges via the shared column masks applied once per kw group of 3 taps.
        """
        def rot(v, k):
            k = k % HW
            return v if k == 0 else pltpu.roll(v, k, axis=1)

        idx = jax.lax.broadcasted_iota(jnp.int32, (1, HW), 1)
        not_row0 = (idx >= W).astype(jnp.float32)            # valid when dh = -1
        not_rowl = (idx < (H - 1) * W).astype(jnp.float32)   # valid when dh = +1
        rows = (rot(x, W) * not_row0,        # dh = -1  (kh = 0)
                x,                           # dh =  0  (kh = 1)
                rot(x, -W) * not_rowl)       # dh = +1  (kh = 2)

        acc = None
        for kw, dw in enumerate((-1, 0, 1)):
            part = None
            for kh in range(3):
                slab = rows[kh] if dw == 0 else rot(rows[kh], -dw)
                t = jnp.dot(w_ref[kh * 3 + kw], slab,
                            preferred_element_type=jnp.float32)
                part = t if part is None else part + t
            if dw == -1:
                part = part * cm_ref[0:1, :]
            elif dw == 1:
                part = part * cm_ref[1:2, :]
            acc = part if acc is None else acc + part
        return acc

    # ------------- phase 1: per-image per-channel sum / sum-of-squares --------
    def stats_kernel(x_ref, w_ref, cm_ref, sum_ref, sumsq_ref):
        y = conv9(x_ref[...], w_ref, cm_ref)                  # (Cout, HW)
        sum_ref[...] = jnp.sum(y, axis=1, keepdims=True)      # (Cout, 1)
        sumsq_ref[...] = jnp.sum(y * y, axis=1, keepdims=True)

    sums, sumsqs = pl.pallas_call(
        stats_kernel,
        out_shape=(jax.ShapeDtypeStruct((N, Cout, 1), jnp.float32),
                   jax.ShapeDtypeStruct((N, Cout, 1), jnp.float32)),
        grid=(N,),
        in_specs=[
            pl.BlockSpec((None, Cin, HW), lambda n: (n, 0, 0)),
            pl.BlockSpec((KH * KW, Cout, Cin), lambda n: (0, 0, 0)),
            pl.BlockSpec((2, HW), lambda n: (0, 0)),
        ],
        out_specs=(pl.BlockSpec((None, Cout, 1), lambda n: (n, 0, 0)),
                   pl.BlockSpec((None, Cout, 1), lambda n: (n, 0, 0))),
        compiler_params=pltpu.CompilerParams(
            dimension_semantics=("parallel",),       # no cross-step state -> both TCs
            vmem_limit_bytes=vmem_limit),
    )(x3, w3, cmask)

    # ---- fold BN (training-mode batch stats) into one per-channel fma ---------
    inv_m = jnp.float32(1.0 / M)
    mean = jnp.sum(sums[:, :, 0], axis=0) * inv_m                 # (Cout,)
    var = jnp.sum(sumsqs[:, :, 0], axis=0) * inv_m - mean * mean  # biased var
    scale = bn_gamma * jax.lax.rsqrt(var + BN_EPS)
    shift = bn_beta - mean * scale

    # ------------- phase 2: recompute conv, BN fma + PReLU, write NCHW --------
    def conv_bn_prelu_kernel(x_ref, w_ref, cm_ref, scale_ref, shift_ref,
                             alpha_ref, o_ref):
        y = conv9(x_ref[...], w_ref, cm_ref)                  # (Cout, HW)
        z = y * scale_ref[...] + shift_ref[...]
        a = alpha_ref[0, 0]
        o_ref[...] = jnp.where(z >= 0, z, a * z)

    out3 = pl.pallas_call(
        conv_bn_prelu_kernel,
        out_shape=jax.ShapeDtypeStruct((N, Cout, HW), jnp.float32),
        grid=(N,),
        in_specs=[
            pl.BlockSpec((None, Cin, HW), lambda n: (n, 0, 0)),
            pl.BlockSpec((KH * KW, Cout, Cin), lambda n: (0, 0, 0)),
            pl.BlockSpec((2, HW), lambda n: (0, 0)),
            pl.BlockSpec((Cout, 1), lambda n: (0, 0)),
            pl.BlockSpec((Cout, 1), lambda n: (0, 0)),
            pl.BlockSpec(memory_space=pltpu.MemorySpace.SMEM),
        ],
        out_specs=pl.BlockSpec((None, Cout, HW), lambda n: (n, 0, 0)),
        compiler_params=pltpu.CompilerParams(
            dimension_semantics=("parallel",),
            vmem_limit_bytes=vmem_limit),
    )(x3, w3, cmask, scale.reshape(Cout, 1), shift.reshape(Cout, 1),
      prelu_a.reshape(1, 1).astype(jnp.float32))

    # already NCHW; this reshape is metadata-only (no transpose pass)
    return out3.reshape(N, Cout, H, W)


if __name__ == "__main__":
    N, Cin, H, W = 2, 4, 16, 16
    Cout, KH, KW = 8, 3, 3

    key = jax.random.PRNGKey(0)
    k_x, k_w, k_b = jax.random.split(key, 3)

    x = jax.random.normal(k_x, (N, Cin, H, W), dtype=jnp.float32)

    fan_in = Cin * KH * KW
    conv_w = jax.random.normal(k_w, (Cout, Cin, KH, KW), dtype=jnp.float32) / jnp.sqrt(fan_in)
    conv_b = jax.random.normal(k_b, (Cout,), dtype=jnp.float32) * 0.1
    bn_gamma = jnp.ones((Cout,), dtype=jnp.float32)    # BatchNorm2d weight init
    bn_beta = jnp.zeros((Cout,), dtype=jnp.float32)    # BatchNorm2d bias init
    prelu_a = jnp.full((1,), 0.25, dtype=jnp.float32)  # PReLU default init

    out = simple_conv2d(x, conv_w, conv_b, bn_gamma, bn_beta, prelu_a)
    jax.block_until_ready(out)
    assert out.shape == (N, Cout, H, W)
    print("KERNEL_OK")
</pallas_src>

<mosaic_0001>
module attributes {stable_mosaic.version = 11 : i64} {
  func.func @stats_kernel(%arg0: i32, %arg1: memref<1x4x256xf32, #tpu.memory_space<vmem>>, %arg2: memref<9x8x4xf32, #tpu.memory_space<vmem>>, %arg3: memref<2x256xf32, #tpu.memory_space<vmem>>, %arg4: memref<1x8x1xf32, #tpu.memory_space<vmem>>, %arg5: memref<1x8x1xf32, #tpu.memory_space<vmem>>) attributes {dimension_semantics = [#tpu.dimension_semantics<parallel>], iteration_bounds = array<i64: 2>, scalar_prefetch = 0 : i64, scratch_operands = 0 : i64, tpu.core_type = #tpu.core_type<tc>, window_params = [{transform_indices = @transform_0, window_bounds = array<i64: 1, 4, 256>}, {pipeline_mode = #tpu.pipeline_mode<synchronous>, transform_indices = @transform_1, window_bounds = array<i64: 9, 8, 4>}, {pipeline_mode = #tpu.pipeline_mode<synchronous>, transform_indices = @transform_2, window_bounds = array<i64: 2, 256>}, {transform_indices = @transform_3, window_bounds = array<i64: 1, 8, 1>}, {transform_indices = @transform_4, window_bounds = array<i64: 1, 8, 1>}]} {
    %c0 = arith.constant 0 : index
    %c0_0 = arith.constant 0 : index
    %c0_1 = arith.constant 0 : index
    %0 = vector.load %arg1[%c0, %c0_0, %c0_1] : memref<1x4x256xf32, #tpu.memory_space<vmem>>, vector<1x4x256xf32>
    %1 = vector.shape_cast %0 : vector<1x4x256xf32> to vector<4x256xf32>
    %2 = tpu.iota {dimensions = array<i32: 1>} : vector<1x256xi32>
    %c16_i32 = arith.constant 16 : i32
    %3 = vector.broadcast %c16_i32 : i32 to vector<1x256xi32>
    %4 = arith.cmpi sge, %2, %3 : vector<1x256xi32>
    %5 = arith.extui %4 : vector<1x256xi1> to vector<1x256xi32>
    %6 = arith.sitofp %5 : vector<1x256xi32> to vector<1x256xf32>
    %c240_i32 = arith.constant 240 : i32
    %7 = vector.broadcast %c240_i32 : i32 to vector<1x256xi32>
    %8 = arith.cmpi slt, %2, %7 : vector<1x256xi32>
    %9 = arith.extui %8 : vector<1x256xi1> to vector<1x256xi32>
    %10 = arith.sitofp %9 : vector<1x256xi32> to vector<1x256xf32>
    %c16_i32_2 = arith.constant 16 : i32
    %11 = tpu.dynamic_rotate %1 by %c16_i32_2 dim 1 : vector<4x256xf32>, i32 -> vector<4x256xf32>
    %12 = vector.broadcast %6 : vector<1x256xf32> to vector<4x256xf32>
    %13 = arith.mulf %11, %12 : vector<4x256xf32>
    %c240_i32_3 = arith.constant 240 : i32
    %14 = tpu.dynamic_rotate %1 by %c240_i32_3 dim 1 : vector<4x256xf32>, i32 -> vector<4x256xf32>
    %15 = vector.broadcast %10 : vector<1x256xf32> to vector<4x256xf32>
    %16 = arith.mulf %14, %15 : vector<4x256xf32>
    %c1_i32 = arith.constant 1 : i32
    %17 = tpu.dynamic_rotate %13 by %c1_i32 dim 1 : vector<4x256xf32>, i32 -> vector<4x256xf32>
    %c0_4 = arith.constant 0 : index
    %c0_5 = arith.constant 0 : index
    %c0_6 = arith.constant 0 : index
    %18 = vector.load %arg2[%c0_4, %c0_5, %c0_6] : memref<9x8x4xf32, #tpu.memory_space<vmem>>, vector<1x8x4xf32>
    %19 = vector.shape_cast %18 : vector<1x8x4xf32> to vector<8x4xf32>
    %cst = arith.constant dense<0.000000e+00> : vector<8x256xf32>
    %20 = tpu.matmul %19, %17, %cst {dimension_numbers = #tpu.dot_dimension_numbers<[1], [0], [0], [1], [0, 0, 1, 1], [], []>} : vector<8x4xf32>, vector<4x256xf32>, vector<8x256xf32> -> vector<8x256xf32>
    %c1_i32_7 = arith.constant 1 : i32
    %21 = tpu.dynamic_rotate %1 by %c1_i32_7 dim 1 : vector<4x256xf32>, i32 -> vector<4x256xf32>
    %c3 = arith.constant 3 : index
    %c0_8 = arith.constant 0 : index
    %c0_9 = arith.constant 0 : index
    %22 = vector.load %arg2[%c3, %c0_8, %c0_9] : memref<9x8x4xf32, #tpu.memory_space<vmem>>, vector<1x8x4xf32>
    %23 = vector.shape_cast %22 : vector<1x8x4xf32> to vector<8x4xf32>
    %cst_10 = arith.constant dense<0.000000e+00> : vector<8x256xf32>
    %24 = tpu.matmul %23, %21, %cst_10 {dimension_numbers = #tpu.dot_dimension_numbers<[1], [0], [0], [1], [0, 0, 1, 1], [], []>} : vector<8x4xf32>, vector<4x256xf32>, vector<8x256xf32> -> vector<8x256xf32>
    %25 = arith.addf %20, %24 : vector<8x256xf32>
    %c1_i32_11 = arith.constant 1 : i32
    %26 = tpu.dynamic_rotate %16 by %c1_i32_11 dim 1 : vector<4x256xf32>, i32 -> vector<4x256xf32>
    %c6 = arith.constant 6 : index
    %c0_12 = arith.constant 0 : index
    %c0_13 = arith.constant 0 : index
    %27 = vector.load %arg2[%c6, %c0_12, %c0_13] : memref<9x8x4xf32, #tpu.memory_space<vmem>>, vector<1x8x4xf32>
    %28 = vector.shape_cast %27 : vector<1x8x4xf32> to vector<8x4xf32>
    %cst_14 = arith.constant dense<0.000000e+00> : vector<8x256xf32>
    %29 = tpu.matmul %28, %26, %cst_14 {dimension_numbers = #tpu.dot_dimension_numbers<[1], [0], [0], [1], [0, 0, 1, 1], [], []>} : vector<8x4xf32>, vector<4x256xf32>, vector<8x256xf32> -> vector<8x256xf32>
    %30 = arith.addf %25, %29 : vector<8x256xf32>
    %c0_15 = arith.constant 0 : index
    %c0_16 = arith.constant 0 : index
    %31 = vector.load %arg3[%c0_15, %c0_16] : memref<2x256xf32, #tpu.memory_space<vmem>>, vector<1x256xf32>
    %32 = vector.broadcast %31 : vector<1x256xf32> to vector<8x256xf32>
    %33 = arith.mulf %30, %32 : vector<8x256xf32>
    %c1 = arith.constant 1 : index
    %c0_17 = arith.constant 0 : index
    %c0_18 = arith.constant 0 : index
    %34 = vector.load %arg2[%c1, %c0_17, %c0_18] : memref<9x8x4xf32, #tpu.memory_space<vmem>>, vector<1x8x4xf32>
    %35 = vector.shape_cast %34 : vector<1x8x4xf32> to vector<8x4xf32>
    %cst_19 = arith.constant dense<0.000000e+00> : vector<8x256xf32>
    %36 = tpu.matmul %35, %13, %cst_19 {dimension_numbers = #tpu.dot_dimension_numbers<[1], [0], [0], [1], [0, 0, 1, 1], [], []>} : vector<8x4xf32>, vector<4x256xf32>, vector<8x256xf32> -> vector<8x256xf32>
    %c4 = arith.constant 4 : index
    %c0_20 = arith.constant 0 : index
    %c0_21 = arith.constant 0 : index
    %37 = vector.load %arg2[%c4, %c0_20, %c0_21] : memref<9x8x4xf32, #tpu.memory_space<vmem>>, vector<1x8x4xf32>
    %38 = vector.shape_cast %37 : vector<1x8x4xf32> to vector<8x4xf32>
    %cst_22 = arith.constant dense<0.000000e+00> : vector<8x256xf32>
    %39 = tpu.matmul %38, %1, %cst_22 {dimension_numbers = #tpu.dot_dimension_numbers<[1], [0], [0], [1], [0, 0, 1, 1], [], []>} : vector<8x4xf32>, vector<4x256xf32>, vector<8x256xf32> -> vector<8x256xf32>
    %40 = arith.addf %36, %39 : vector<8x256xf32>
    %c7 = arith.constant 7 : index
    %c0_23 = arith.constant 0 : index
    %c0_24 = arith.constant 0 : index
    %41 = vector.load %arg2[%c7, %c0_23, %c0_24] : memref<9x8x4xf32, #tpu.memory_space<vmem>>, vector<1x8x4xf32>
    %42 = vector.shape_cast %41 : vector<1x8x4xf32> to vector<8x4xf32>
    %cst_25 = arith.constant dense<0.000000e+00> : vector<8x256xf32>
    %43 = tpu.matmul %42, %16, %cst_25 {dimension_numbers = #tpu.dot_dimension_numbers<[1], [0], [0], [1], [0, 0, 1, 1], [], []>} : vector<8x4xf32>, vector<4x256xf32>, vector<8x256xf32> -> vector<8x256xf32>
    %44 = arith.addf %40, %43 : vector<8x256xf32>
    %45 = arith.addf %33, %44 : vector<8x256xf32>
    %c255_i32 = arith.constant 255 : i32
    %46 = tpu.dynamic_rotate %13 by %c255_i32 dim 1 : vector<4x256xf32>, i32 -> vector<4x256xf32>
    %c2 = arith.constant 2 : index
    %c0_26 = arith.constant 0 : index
    %c0_27 = arith.constant 0 : index
    %47 = vector.load %arg2[%c2, %c0_26, %c0_27] : memref<9x8x4xf32, #tpu.memory_space<vmem>>, vector<1x8x4xf32>
    %48 = vector.shape_cast %47 : vector<1x8x4xf32> to vector<8x4xf32>
    %cst_28 = arith.constant dense<0.000000e+00> : vector<8x256xf32>
    %49 = tpu.matmul %48, %46, %cst_28 {dimension_numbers = #tpu.dot_dimension_numbers<[1], [0], [0], [1], [0, 0, 1, 1], [], []>} : vector<8x4xf32>, vector<4x256xf32>, vector<8x256xf32> -> vector<8x256xf32>
    %c255_i32_29 = arith.constant 255 : i32
    %50 = tpu.dynamic_rotate %1 by %c255_i32_29 dim 1 : vector<4x256xf32>, i32 -> vector<4x256xf32>
    %c5 = arith.constant 5 : index
    %c0_30 = arith.constant 0 : index
    %c0_31 = arith.constant 0 : index
    %51 = vector.load %arg2[%c5, %c0_30, %c0_31] : memref<9x8x4xf32, #tpu.memory_space<vmem>>, vector<1x8x4xf32>
    %52 = vector.shape_cast %51 : vector<1x8x4xf32> to vector<8x4xf32>
    %cst_32 = arith.constant dense<0.000000e+00> : vector<8x256xf32>
    %53 = tpu.matmul %52, %50, %cst_32 {dimension_numbers = #tpu.dot_dimension_numbers<[1], [0], [0], [1], [0, 0, 1, 1], [], []>} : vector<8x4xf32>, vector<4x256xf32>, vector<8x256xf32> -> vector<8x256xf32>
    %54 = arith.addf %49, %53 : vector<8x256xf32>
    %c255_i32_33 = arith.constant 255 : i32
    %55 = tpu.dynamic_rotate %16 by %c255_i32_33 dim 1 : vector<4x256xf32>, i32 -> vector<4x256xf32>
    %c8 = arith.constant 8 : index
    %c0_34 = arith.constant 0 : index
    %c0_35 = arith.constant 0 : index
    %56 = vector.load %arg2[%c8, %c0_34, %c0_35] : memref<9x8x4xf32, #tpu.memory_space<vmem>>, vector<1x8x4xf32>
    %57 = vector.shape_cast %56 : vector<1x8x4xf32> to vector<8x4xf32>
    %cst_36 = arith.constant dense<0.000000e+00> : vector<8x256xf32>
    %58 = tpu.matmul %57, %55, %cst_36 {dimension_numbers = #tpu.dot_dimension_numbers<[1], [0], [0], [1], [0, 0, 1, 1], [], []>} : vector<8x4xf32>, vector<4x256xf32>, vector<8x256xf32> -> vector<8x256xf32>
    %59 = arith.addf %54, %58 : vector<8x256xf32>
    %c1_37 = arith.constant 1 : index
    %c0_38 = arith.constant 0 : index
    %60 = vector.load %arg3[%c1_37, %c0_38] : memref<2x256xf32, #tpu.memory_space<vmem>>, vector<1x256xf32>
    %61 = vector.broadcast %60 : vector<1x256xf32> to vector<8x256xf32>
    %62 = arith.mulf %59, %61 : vector<8x256xf32>
    %63 = arith.addf %45, %62 : vector<8x256xf32>
    %cst_39 = arith.constant dense<0.000000e+00> : vector<8xf32>
    %64 = vector.multi_reduction <add>, %63, %cst_39 [1] : vector<8x256xf32> to vector<8xf32>
    %65 = vector.shape_cast %64 : vector<8xf32> to vector<8x1xf32>
    %c0_40 = arith.constant 0 : index
    %c0_41 = arith.constant 0 : index
    %c0_42 = arith.constant 0 : index
    %66 = vector.load %arg4[%c0_40, %c0_41, %c0_42] : memref<1x8x1xf32, #tpu.memory_space<vmem>>, vector<1x8x1xf32>
    %67 = vector.shape_cast %66 : vector<1x8x1xf32> to vector<8x1xf32>
    %68 = vector.shape_cast %65 : vector<8x1xf32> to vector<1x8x1xf32>
    tpu.vector_store %arg4[%c0_40, %c0_41, %c0_42], %68 {strides = array<i32>} : memref<1x8x1xf32, #tpu.memory_space<vmem>>, vector<1x8x1xf32>,
    %69 = arith.mulf %63, %63 : vector<8x256xf32>
    %cst_43 = arith.constant dense<0.000000e+00> : vector<8xf32>
    %70 = vector.multi_reduction <add>, %69, %cst_43 [1] : vector<8x256xf32> to vector<8xf32>
    %71 = vector.shape_cast %70 : vector<8xf32> to vector<8x1xf32>
    %c0_44 = arith.constant 0 : index
    %c0_45 = arith.constant 0 : index
    %c0_46 = arith.constant 0 : index
    %72 = vector.load %arg5[%c0_44, %c0_45, %c0_46] : memref<1x8x1xf32, #tpu.memory_space<vmem>>, vector<1x8x1xf32>
    %73 = vector.shape_cast %72 : vector<1x8x1xf32> to vector<8x1xf32>
    %74 = vector.shape_cast %71 : vector<8x1xf32> to vector<1x8x1xf32>
    tpu.vector_store %arg5[%c0_44, %c0_45, %c0_46], %74 {strides = array<i32>} : memref<1x8x1xf32, #tpu.memory_space<vmem>>, vector<1x8x1xf32>,
    return
  }
  func.func @transform_0(%arg0: i32) -> (i32, i32, i32) {
    %c0_i32 = arith.constant 0 : i32
    %c0_i32_0 = arith.constant 0 : i32
    %c0_i32_1 = arith.constant 0 : i32
    return %arg0, %c0_i32, %c0_i32_0 : i32, i32, i32
  }
  func.func @transform_1(%arg0: i32) -> (i32, i32, i32) {
    %c0_i32 = arith.constant 0 : i32
    %c0_i32_0 = arith.constant 0 : i32
    %c0_i32_1 = arith.constant 0 : i32
    %c0_i32_2 = arith.constant 0 : i32
    return %c0_i32, %c0_i32_0, %c0_i32_1 : i32, i32, i32
  }
  func.func @transform_2(%arg0: i32) -> (i32, i32) {
    %c0_i32 = arith.constant 0 : i32
    %c0_i32_0 = arith.constant 0 : i32
    %c0_i32_1 = arith.constant 0 : i32
    return %c0_i32, %c0_i32_0 : i32, i32
  }
  func.func @transform_3(%arg0: i32) -> (i32, i32, i32) {
    %c0_i32 = arith.constant 0 : i32
    %c0_i32_0 = arith.constant 0 : i32
    %c0_i32_1 = arith.constant 0 : i32
    return %arg0, %c0_i32, %c0_i32_0 : i32, i32, i32
  }
  func.func @transform_4(%arg0: i32) -> (i32, i32, i32) {
    %c0_i32 = arith.constant 0 : i32
    %c0_i32_0 = arith.constant 0 : i32
    %c0_i32_1 = arith.constant 0 : i32
    return %arg0, %c0_i32, %c0_i32_0 : i32, i32, i32
  }
}

module attributes {stable_mosaic.version = 11 : i64} {
  func.func @conv_bn_prelu_kernel(%arg0: i32, %arg1: memref<1x4x256xf32, #tpu.memory_space<vmem>>, %arg2: memref<9x8x4xf32, #tpu.memory_space<vmem>>, %arg3: memref<2x256xf32, #tpu.memory_space<vmem>>, %arg4: memref<8x1xf32, #tpu.memory_space<vmem>>, %arg5: memref<8x1xf32, #tpu.memory_space<vmem>>, %arg6: memref<1x1xf32, #tpu.memory_space<smem>>, %arg7: memref<1x8x256xf32, #tpu.memory_space<vmem>>) attributes {dimension_semantics = [#tpu.dimension_semantics<parallel>], iteration_bounds = array<i64: 2>, scalar_prefetch = 0 : i64, scratch_operands = 0 : i64, tpu.core_type = #tpu.core_type<tc>, window_params = [{transform_indices = @transform_0, window_bounds = array<i64: 1, 4, 256>}, {pipeline_mode = #tpu.pipeline_mode<synchronous>, transform_indices = @transform_1, window_bounds = array<i64: 9, 8, 4>}, {pipeline_mode = #tpu.pipeline_mode<synchronous>, transform_indices = @transform_2, window_bounds = array<i64: 2, 256>}, {pipeline_mode = #tpu.pipeline_mode<synchronous>, transform_indices = @transform_3, window_bounds = array<i64: 8, 1>}, {pipeline_mode = #tpu.pipeline_mode<synchronous>, transform_indices = @transform_4, window_bounds = array<i64: 8, 1>}, {transform_indices = @transform_5, window_bounds = array<i64: 1, 1>}, {transform_indices = @transform_6, window_bounds = array<i64: 1, 8, 256>}]} {
    %c0 = arith.constant 0 : index
    %c0_0 = arith.constant 0 : index
    %c0_1 = arith.constant 0 : index
    %0 = vector.load %arg1[%c0, %c0_0, %c0_1] : memref<1x4x256xf32, #tpu.memory_space<vmem>>, vector<1x4x256xf32>
    %1 = vector.shape_cast %0 : vector<1x4x256xf32> to vector<4x256xf32>
    %2 = tpu.iota {dimensions = array<i32: 1>} : vector<1x256xi32>
    %c16_i32 = arith.constant 16 : i32
    %3 = vector.broadcast %c16_i32 : i32 to vector<1x256xi32>
    %4 = arith.cmpi sge, %2, %3 : vector<1x256xi32>
    %5 = arith.extui %4 : vector<1x256xi1> to vector<1x256xi32>
    %6 = arith.sitofp %5 : vector<1x256xi32> to vector<1x256xf32>
    %c240_i32 = arith.constant 240 : i32
    %7 = vector.broadcast %c240_i32 : i32 to vector<1x256xi32>
    %8 = arith.cmpi slt, %2, %7 : vector<1x256xi32>
    %9 = arith.extui %8 : vector<1x256xi1> to vector<1x256xi32>
    %10 = arith.sitofp %9 : vector<1x256xi32> to vector<1x256xf32>
    %c16_i32_2 = arith.constant 16 : i32
    %11 = tpu.dynamic_rotate %1 by %c16_i32_2 dim 1 : vector<4x256xf32>, i32 -> vector<4x256xf32>
    %12 = vector.broadcast %6 : vector<1x256xf32> to vector<4x256xf32>
    %13 = arith.mulf %11, %12 : vector<4x256xf32>
    %c240_i32_3 = arith.constant 240 : i32
    %14 = tpu.dynamic_rotate %1 by %c240_i32_3 dim 1 : vector<4x256xf32>, i32 -> vector<4x256xf32>
    %15 = vector.broadcast %10 : vector<1x256xf32> to vector<4x256xf32>
    %16 = arith.mulf %14, %15 : vector<4x256xf32>
    %c1_i32 = arith.constant 1 : i32
    %17 = tpu.dynamic_rotate %13 by %c1_i32 dim 1 : vector<4x256xf32>, i32 -> vector<4x256xf32>
    %c0_4 = arith.constant 0 : index
    %c0_5 = arith.constant 0 : index
    %c0_6 = arith.constant 0 : index
    %18 = vector.load %arg2[%c0_4, %c0_5, %c0_6] : memref<9x8x4xf32, #tpu.memory_space<vmem>>, vector<1x8x4xf32>
    %19 = vector.shape_cast %18 : vector<1x8x4xf32> to vector<8x4xf32>
    %cst = arith.constant dense<0.000000e+00> : vector<8x256xf32>
    %20 = tpu.matmul %19, %17, %cst {dimension_numbers = #tpu.dot_dimension_numbers<[1], [0], [0], [1], [0, 0, 1, 1], [], []>} : vector<8x4xf32>, vector<4x256xf32>, vector<8x256xf32> -> vector<8x256xf32>
    %c1_i32_7 = arith.constant 1 : i32
    %21 = tpu.dynamic_rotate %1 by %c1_i32_7 dim 1 : vector<4x256xf32>, i32 -> vector<4x256xf32>
    %c3 = arith.constant 3 : index
    %c0_8 = arith.constant 0 : index
    %c0_9 = arith.constant 0 : index
    %22 = vector.load %arg2[%c3, %c0_8, %c0_9] : memref<9x8x4xf32, #tpu.memory_space<vmem>>, vector<1x8x4xf32>
    %23 = vector.shape_cast %22 : vector<1x8x4xf32> to vector<8x4xf32>
    %cst_10 = arith.constant dense<0.000000e+00> : vector<8x256xf32>
    %24 = tpu.matmul %23, %21, %cst_10 {dimension_numbers = #tpu.dot_dimension_numbers<[1], [0], [0], [1], [0, 0, 1, 1], [], []>} : vector<8x4xf32>, vector<4x256xf32>, vector<8x256xf32> -> vector<8x256xf32>
    %25 = arith.addf %20, %24 : vector<8x256xf32>
    %c1_i32_11 = arith.constant 1 : i32
    %26 = tpu.dynamic_rotate %16 by %c1_i32_11 dim 1 : vector<4x256xf32>, i32 -> vector<4x256xf32>
    %c6 = arith.constant 6 : index
    %c0_12 = arith.constant 0 : index
    %c0_13 = arith.constant 0 : index
    %27 = vector.load %arg2[%c6, %c0_12, %c0_13] : memref<9x8x4xf32, #tpu.memory_space<vmem>>, vector<1x8x4xf32>
    %28 = vector.shape_cast %27 : vector<1x8x4xf32> to vector<8x4xf32>
    %cst_14 = arith.constant dense<0.000000e+00> : vector<8x256xf32>
    %29 = tpu.matmul %28, %26, %cst_14 {dimension_numbers = #tpu.dot_dimension_numbers<[1], [0], [0], [1], [0, 0, 1, 1], [], []>} : vector<8x4xf32>, vector<4x256xf32>, vector<8x256xf32> -> vector<8x256xf32>
    %30 = arith.addf %25, %29 : vector<8x256xf32>
    %c0_15 = arith.constant 0 : index
    %c0_16 = arith.constant 0 : index
    %31 = vector.load %arg3[%c0_15, %c0_16] : memref<2x256xf32, #tpu.memory_space<vmem>>, vector<1x256xf32>
    %32 = vector.broadcast %31 : vector<1x256xf32> to vector<8x256xf32>
    %33 = arith.mulf %30, %32 : vector<8x256xf32>
    %c1 = arith.constant 1 : index
    %c0_17 = arith.constant 0 : index
    %c0_18 = arith.constant 0 : index
    %34 = vector.load %arg2[%c1, %c0_17, %c0_18] : memref<9x8x4xf32, #tpu.memory_space<vmem>>, vector<1x8x4xf32>
    %35 = vector.shape_cast %34 : vector<1x8x4xf32> to vector<8x4xf32>
    %cst_19 = arith.constant dense<0.000000e+00> : vector<8x256xf32>
    %36 = tpu.matmul %35, %13, %cst_19 {dimension_numbers = #tpu.dot_dimension_numbers<[1], [0], [0], [1], [0, 0, 1, 1], [], []>} : vector<8x4xf32>, vector<4x256xf32>, vector<8x256xf32> -> vector<8x256xf32>
    %c4 = arith.constant 4 : index
    %c0_20 = arith.constant 0 : index
    %c0_21 = arith.constant 0 : index
    %37 = vector.load %arg2[%c4, %c0_20, %c0_21] : memref<9x8x4xf32, #tpu.memory_space<vmem>>, vector<1x8x4xf32>
    %38 = vector.shape_cast %37 : vector<1x8x4xf32> to vector<8x4xf32>
    %cst_22 = arith.constant dense<0.000000e+00> : vector<8x256xf32>
    %39 = tpu.matmul %38, %1, %cst_22 {dimension_numbers = #tpu.dot_dimension_numbers<[1], [0], [0], [1], [0, 0, 1, 1], [], []>} : vector<8x4xf32>, vector<4x256xf32>, vector<8x256xf32> -> vector<8x256xf32>
    %40 = arith.addf %36, %39 : vector<8x256xf32>
    %c7 = arith.constant 7 : index
    %c0_23 = arith.constant 0 : index
    %c0_24 = arith.constant 0 : index
    %41 = vector.load %arg2[%c7, %c0_23, %c0_24] : memref<9x8x4xf32, #tpu.memory_space<vmem>>, vector<1x8x4xf32>
    %42 = vector.shape_cast %41 : vector<1x8x4xf32> to vector<8x4xf32>
    %cst_25 = arith.constant dense<0.000000e+00> : vector<8x256xf32>
    %43 = tpu.matmul %42, %16, %cst_25 {dimension_numbers = #tpu.dot_dimension_numbers<[1], [0], [0], [1], [0, 0, 1, 1], [], []>} : vector<8x4xf32>, vector<4x256xf32>, vector<8x256xf32> -> vector<8x256xf32>
    %44 = arith.addf %40, %43 : vector<8x256xf32>
    %45 = arith.addf %33, %44 : vector<8x256xf32>
    %c255_i32 = arith.constant 255 : i32
    %46 = tpu.dynamic_rotate %13 by %c255_i32 dim 1 : vector<4x256xf32>, i32 -> vector<4x256xf32>
    %c2 = arith.constant 2 : index
    %c0_26 = arith.constant 0 : index
    %c0_27 = arith.constant 0 : index
    %47 = vector.load %arg2[%c2, %c0_26, %c0_27] : memref<9x8x4xf32, #tpu.memory_space<vmem>>, vector<1x8x4xf32>
    %48 = vector.shape_cast %47 : vector<1x8x4xf32> to vector<8x4xf32>
    %cst_28 = arith.constant dense<0.000000e+00> : vector<8x256xf32>
    %49 = tpu.matmul %48, %46, %cst_28 {dimension_numbers = #tpu.dot_dimension_numbers<[1], [0], [0], [1], [0, 0, 1, 1], [], []>} : vector<8x4xf32>, vector<4x256xf32>, vector<8x256xf32> -> vector<8x256xf32>
    %c255_i32_29 = arith.constant 255 : i32
    %50 = tpu.dynamic_rotate %1 by %c255_i32_29 dim 1 : vector<4x256xf32>, i32 -> vector<4x256xf32>
    %c5 = arith.constant 5 : index
    %c0_30 = arith.constant 0 : index
    %c0_31 = arith.constant 0 : index
    %51 = vector.load %arg2[%c5, %c0_30, %c0_31] : memref<9x8x4xf32, #tpu.memory_space<vmem>>, vector<1x8x4xf32>
    %52 = vector.shape_cast %51 : vector<1x8x4xf32> to vector<8x4xf32>
    %cst_32 = arith.constant dense<0.000000e+00> : vector<8x256xf32>
    %53 = tpu.matmul %52, %50, %cst_32 {dimension_numbers = #tpu.dot_dimension_numbers<[1], [0], [0], [1], [0, 0, 1, 1], [], []>} : vector<8x4xf32>, vector<4x256xf32>, vector<8x256xf32> -> vector<8x256xf32>
    %54 = arith.addf %49, %53 : vector<8x256xf32>
    %c255_i32_33 = arith.constant 255 : i32
    %55 = tpu.dynamic_rotate %16 by %c255_i32_33 dim 1 : vector<4x256xf32>, i32 -> vector<4x256xf32>
    %c8 = arith.constant 8 : index
    %c0_34 = arith.constant 0 : index
    %c0_35 = arith.constant 0 : index
    %56 = vector.load %arg2[%c8, %c0_34, %c0_35] : memref<9x8x4xf32, #tpu.memory_space<vmem>>, vector<1x8x4xf32>
    %57 = vector.shape_cast %56 : vector<1x8x4xf32> to vector<8x4xf32>
    %cst_36 = arith.constant dense<0.000000e+00> : vector<8x256xf32>
    %58 = tpu.matmul %57, %55, %cst_36 {dimension_numbers = #tpu.dot_dimension_numbers<[1], [0], [0], [1], [0, 0, 1, 1], [], []>} : vector<8x4xf32>, vector<4x256xf32>, vector<8x256xf32> -> vector<8x256xf32>
    %59 = arith.addf %54, %58 : vector<8x256xf32>
    %c1_37 = arith.constant 1 : index
    %c0_38 = arith.constant 0 : index
    %60 = vector.load %arg3[%c1_37, %c0_38] : memref<2x256xf32, #tpu.memory_space<vmem>>, vector<1x256xf32>
    %61 = vector.broadcast %60 : vector<1x256xf32> to vector<8x256xf32>
    %62 = arith.mulf %59, %61 : vector<8x256xf32>
    %63 = arith.addf %45, %62 : vector<8x256xf32>
    %c0_39 = arith.constant 0 : index
    %c0_40 = arith.constant 0 : index
    %64 = vector.load %arg4[%c0_39, %c0_40] : memref<8x1xf32, #tpu.memory_space<vmem>>, vector<8x1xf32>
    %65 = vector.broadcast %64 : vector<8x1xf32> to vector<8x256xf32>
    %66 = arith.mulf %63, %65 : vector<8x256xf32>
    %c0_41 = arith.constant 0 : index
    %c0_42 = arith.constant 0 : index
    %67 = vector.load %arg5[%c0_41, %c0_42] : memref<8x1xf32, #tpu.memory_space<vmem>>, vector<8x1xf32>
    %68 = vector.broadcast %67 : vector<8x1xf32> to vector<8x256xf32>
    %69 = arith.addf %66, %68 : vector<8x256xf32>
    %c0_43 = arith.constant 0 : index
    %c0_44 = arith.constant 0 : index
    %70 = memref.load %arg6[%c0_43, %c0_44] : memref<1x1xf32, #tpu.memory_space<smem>>
    %cst_45 = arith.constant 0.000000e+00 : f32
    %71 = vector.broadcast %cst_45 : f32 to vector<8x256xf32>
    %72 = arith.cmpf oge, %69, %71 : vector<8x256xf32>
    %73 = vector.broadcast %70 : f32 to vector<8x256xf32>
    %74 = arith.mulf %73, %69 : vector<8x256xf32>
    %75 = arith.select %72, %69, %74 : vector<8x256xi1>, vector<8x256xf32>
    %c0_46 = arith.constant 0 : index
    %c0_47 = arith.constant 0 : index
    %c0_48 = arith.constant 0 : index
    %76 = vector.load %arg7[%c0_46, %c0_47, %c0_48] : memref<1x8x256xf32, #tpu.memory_space<vmem>>, vector<1x8x256xf32>
    %77 = vector.shape_cast %76 : vector<1x8x256xf32> to vector<8x256xf32>
    %78 = vector.shape_cast %75 : vector<8x256xf32> to vector<1x8x256xf32>
    tpu.vector_store %arg7[%c0_46, %c0_47, %c0_48], %78 {strides = array<i32>} : memref<1x8x256xf32, #tpu.memory_space<vmem>>, vector<1x8x256xf32>,
    return
  }
  func.func @transform_0(%arg0: i32) -> (i32, i32, i32) {
    %c0_i32 = arith.constant 0 : i32
    %c0_i32_0 = arith.constant 0 : i32
    %c0_i32_1 = arith.constant 0 : i32
    return %arg0, %c0_i32, %c0_i32_0 : i32, i32, i32
  }
  func.func @transform_1(%arg0: i32) -> (i32, i32, i32) {
    %c0_i32 = arith.constant 0 : i32
    %c0_i32_0 = arith.constant 0 : i32
    %c0_i32_1 = arith.constant 0 : i32
    %c0_i32_2 = arith.constant 0 : i32
    return %c0_i32, %c0_i32_0, %c0_i32_1 : i32, i32, i32
  }
  func.func @transform_2(%arg0: i32) -> (i32, i32) {
    %c0_i32 = arith.constant 0 : i32
    %c0_i32_0 = arith.constant 0 : i32
    %c0_i32_1 = arith.constant 0 : i32
    return %c0_i32, %c0_i32_0 : i32, i32
  }
  func.func @transform_3(%arg0: i32) -> (i32, i32) {
    %c0_i32 = arith.constant 0 : i32
    %c0_i32_0 = arith.constant 0 : i32
    %c0_i32_1 = arith.constant 0 : i32
    return %c0_i32, %c0_i32_0 : i32, i32
  }
  func.func @transform_4(%arg0: i32) -> (i32, i32) {
    %c0_i32 = arith.constant 0 : i32
    %c0_i32_0 = arith.constant 0 : i32
    %c0_i32_1 = arith.constant 0 : i32
    return %c0_i32, %c0_i32_0 : i32, i32
  }
  func.func @transform_5(%arg0: i32) -> (i32, i32) {
    %c0_i32 = arith.constant 0 : i32
    %c0_i32_0 = arith.constant 0 : i32
    %c0_i32_1 = arith.constant 0 : i32
    return %c0_i32, %c0_i32_0 : i32, i32
  }
  func.func @transform_6(%arg0: i32) -> (i32, i32, i32) {
    %c0_i32 = arith.constant 0 : i32
    %c0_i32_0 = arith.constant 0 : i32
    %c0_i32_1 = arith.constant 0 : i32
    return %arg0, %c0_i32, %c0_i32_0 : i32, i32, i32
  }
}

</mosaic_0001>

<bundles_post_ra>
// kernel: simple_conv2d.2
= control target key start
LH: loop header
LB: loop body
LE: loop exit
PB: predicated region body
PF: predicated region fallthrough
CT: control target
= control target key end

     0   :  { %s1267_s15 = smov 0   ;;  %s1411_s0 = inlined_call_operand.vmem [shape: f32[2,4,256], index: 0, kind: input, shape index: {}]   ;;  %s1412_s1 = inlined_call_operand.vmem [shape: f32[9,8,4], index: 1, kind: input, shape index: {}]   ;;  %s1413_s2 = inlined_call_operand.vmem [shape: f32[2,256], index: 2, kind: input, shape index: {}]   ;;  %s1414_s3 = inlined_call_operand.vmem [shape: f32[2,8,1], index: 3, kind: output, shape index: {0}]   ;;  %s1415_s4 = inlined_call_operand.vmem [shape: f32[2,8,1], index: 4, kind: output, shape index: {1}]  }
   0x1 LB: > { %s1153_s16 = sadd.s32 4294967295, %s1235_s15   ;;  %p1157_p0 = scmp.ge.s32.totalorder %s1235_s15, 1  ;;  %s1235_s15 = sphi %s1267_s15, %s15_s15  }
   0x2   : > { %p165_p1 = scmp.lt.s32.totalorder %s1235_s15, 3 }
   0x4   : > { %p166_p2 = pnand %p1157_p0, %p165_p1 }
   0x5   : > { %p194_p3 = scmp.lt.s32.totalorder (!%p166_p2), %s1153_s16, 1  ;;  %v1237_v0 = vmov (!%p166_p2), 0.0   ;;  %s1238_s21 = smov (!%p166_p2), 16   ;;  %v208_v3 = vlaneseq (!%p166_p2)  ;;  %vm264_vm5 = vcmask (!%p166_p2), 1043456   ;;  %v251_v22 = vld [vmem:[%s1412_s1] sm:$0xff] (!%p166_p2)  ;;  %vm260_vm6 = vcmask (!%p166_p2), 31744  }
   0x6   : > { %169 = sbr.rel (%p166_p2) target bundleno = 649 (0x289), region = 32  ;;  %415 = vmatprep.mubr.f32.mxu0 (!%p166_p2), %v1237_v0  ;;  %335 = vmatprep.mubr.f32.mxu1 (!%p166_p2), %v1237_v0  ;;  %s1239_s22 = smov (!%p166_p2), 112   ;;  %v1164_v27 = vld [vmem:[%s1412_s1 + $0x18] sm:$0xff] (!%p166_p2)  ;;  %v1171_v32 = vld [vmem:[%s1412_s1 + $0x30] sm:$0xff] (!%p166_p2)  ;;  %v1176_v33 = vld [vmem:[%s1412_s1 + $0x20] sm:$0xff] (!%p166_p2)  ;;  %vm1061_vm8 = vcmask (!%p166_p2), 7168  }
   0x7   : > { %v1290_v4 = vand.u32 (!%p166_p2), 127, %v208_v3  ;;  %s1240_s23 = smov (!%p166_p2), 1   ;;  %s1241_s24 = smov (!%p166_p2), 127   ;;  %v1188_v38 = vld [vmem:[%s1412_s1 + $0x28] sm:$0xff] (!%p166_p2)  ;;  %v1187_v47 = vld [vmem:[%s1412_s1 + $0x10] sm:$0xff] (!%p166_p2)  ;;  %v1183_v49 = vld [vmem:[%s1412_s1 + $0x38] sm:$0xff] (!%p166_p2) }
   0x8   : > { %v1175_v43 = vld [vmem:[%s1412_s1 + $0x8] sm:$0xff] (!%p166_p2)  ;;  %v1195_v50 = vld [vmem:[%s1412_s1 + $0x40] sm:$0xff] (!%p166_p2)  ;;  %v515_v57 = vshrl.u32 (!%p166_p2), %v208_v3, 7 }
   0x9   : > { %vm211_vm0 = vcmp.ge.s32.totalorder (!%p166_p2), %v1290_v4, 16  ;;  %vm230_vm1 = vcmp.lt.s32.totalorder (!%p166_p2), %v1290_v4, 16  ;;  %v210_v7 = vadd.s32 (!%p166_p2), 128, %v1290_v4  ;;  %vm239_vm3 = vcmp.lt.s32.totalorder (!%p166_p2), %v1290_v4, 112 }
   0xa   : > { %v1162_v8 = vsel (!%p166_p2), %vm211_vm0, 1.0, %v1237_v0  ;;  %vm248_vm4 = vcmp.lt.s32.totalorder (!%p166_p2), %v1290_v4, 1  ;;  %vm778_vm7 = vcmp.lt.s32.totalorder (!%p166_p2), %v1290_v4, 127  ;;  %v516_v58 = vsub.s32 (!%p166_p2), 0, %v515_v57 }
   0xb   : > { %vm218_vm2 = vcmp.lt.s32.totalorder (!%p166_p2), %v210_v7, 240  ;;  %v512_v59 = vld [vmem:[%s1413_s2] ss:$2 sm:$0x3] (!%p166_p2)  ;;  %v520_v60 = vsub.s32 (!%p166_p2), 1, %v515_v57 }
   0xc   : > { %v1163_v14 = vsel (!%p166_p2), %vm218_vm2, 1.0, %v1237_v0  ;;  %v517_v61 = vrot.slane (!%p166_p2), %v512_v59, %v516_v58  ;;  %v1199_v63 = vld [vmem:[%s1413_s2 + $0x1] ss:$2 sm:$0x3] (!%p166_p2) }
   0xd   : > { %s1417_s16 = smov (!%p194_p3, %s1153_s16), 1  ;;  %v521_v62 = vrot.slane %v512_v59, %v520_v60  ;;  %v1051_v7 = vrot.slane %v1199_v63, %v520_v60 }
   0xe   : > { %s1277_s17 = sshll.u32 %s1417_s16, 3 }
   0xf   : > { %s198_s20 = scalar_lea.vmem %s1411_s0, %s1277_s17  ;;  %s202_s25 = scalar_lea.vmem %s1414_s3, %s1277_s17 }
  0x10   : > { %v1283_v1 = vld [vmem:[%s198_s20] sm:$0xff]  ;;  %s206_s28 = scalar_lea.vmem %s1415_s4, %s1277_s17 }
  0x11   : > { %226 = vrot.lane.b32.xlu0 %v1283_v1, %s1238_s21  ;;  %235 = vrot.lane.b32.xlu1 %v1283_v1, %s1239_s22  ;;  %v224_v2 = vcombine.high %v1283_v1, %v1283_v1 }
  0x15   : > { %228 = vrot.lane.b32.xlu0 %v224_v2, %s1238_s21  ;;  %237 = vrot.lane.b32.xlu1 %v224_v2, %s1239_s22 }
  0x83   : > { %v227_v5 = vpop.permute.xlu0 %226  ;;  %v236_v6 = vpop.permute.xlu1 %235 }
  0x87   : > { %v229_v9 = vpop.permute.xlu0 %228  ;;  %v238_v13 = vpop.permute.xlu1 %237 }
  0x88   : > { %v232_v10 = vsel %vm230_vm1, %v229_v9, %v227_v5  ;;  %v231_v11 = vsel %vm230_vm1, %v227_v5, %v229_v9  ;;  %v241_v15 = vsel %vm239_vm3, %v238_v13, %v236_v6  ;;  %v1299_v17 = vsel %vm239_vm3, %v236_v6, %v238_v13 }
  0x89   : > { %v233_v12 = vmul.f32 %v1162_v8, %v232_v10  ;;  %246 = vrot.lane.b32.xlu1 %v231_v11, %s1240_s23  ;;  %v243_v16 = vmul.f32 %v1163_v14, %v241_v15  ;;  %v1047_v6 = vrot.slane %v1199_v63, %v516_v58 }
  0x8b   : > { %244 = vrot.lane.b32.xlu0 %v233_v12, %s1240_s23 }
  0x8d   : > { %254 = vrot.lane.b32.xlu1 %v224_v2, %s1240_s23 }
  0x8f   : > { %252 = vrot.lane.b32.xlu0 %v1283_v1, %s1240_s23 }
  0x91   : > { %424 = vrot.lane.b32.xlu1 %v243_v16, %s1240_s23 }
  0x93   : > { %422 = vrot.lane.b32.xlu0 %v1299_v17, %s1240_s23 }
  0x95   : > { %785 = vrot.lane.b32.xlu1 %v224_v2, %s1241_s24 }
  0x97   : > { %783 = vrot.lane.b32.xlu0 %v1283_v1, %s1241_s24 }
  0x99   : > { %776 = vrot.lane.b32.xlu1 %v231_v11, %s1241_s24 }
  0x9b   : > { %774 = vrot.lane.b32.xlu0 %v233_v12, %s1241_s24 }
  0x9d   : > { %953 = vrot.lane.b32.xlu1 %v243_v16, %s1241_s24 }
  0x9f   : > { %951 = vrot.lane.b32.xlu0 %v1299_v17, %s1241_s24 }
  0xfb   : > { %v247_v18 = vpop.permute.xlu1 %246 }
  0xfd   : > { %v245_v19 = vpop.permute.xlu0 %244 }
  0xfe   : > { %v249_v20 = vsel %vm248_vm4, %v245_v19, %v247_v18  ;;  %v250_v21 = vsel %vm248_vm4, %v247_v18, %v245_v19 }
  0xff   : > { %1168 = vmatprep.subr.msk.mxu0 %vm264_vm5, %v249_v20  ;;  %v255_v23 = vpop.permute.xlu1 %254 }
 0x100   : > { %1169 = vmatpush1.msk.msra.mxu0 %vm264_vm5, %v250_v21 }
 0x101   : > { %v253_v24 = vpop.permute.xlu0 %252  ;;  %1170 = vmatmul.mubr.msk.f32.vlgmr.msra.gmra.mrb[0].mxu0 %vm260_vm6, %v251_v22 }
 0x102   : > { %v256_v25 = vsel %vm248_vm4, %v253_v24, %v255_v23  ;;  %v257_v26 = vsel %vm248_vm4, %v255_v23, %v253_v24  ;;  %503 = vmatprep.mubr.f32.mxu0 %v1237_v0 }
 0x103   : > { %1165 = vmatprep.subr.msk.mxu1 %vm264_vm5, %v256_v25  ;;  %v425_v28 = vpop.permute.xlu1 %424 }
 0x104   : > { %1166 = vmatpush1.msk.msra.mxu1 %vm264_vm5, %v257_v26 }
 0x105   : > { %v423_v29 = vpop.permute.xlu0 %422  ;;  %1167 = vmatmul.mubr.msk.f32.vlgmr.msra.gmra.mrb[0].mxu1 %vm260_vm6, %v1164_v27  ;;  %1177 = vmatprep.subr.msk.mxu1 %vm264_vm5, %v224_v2 }
 0x106   : > { %v426_v30 = vsel %vm248_vm4, %v423_v29, %v425_v28  ;;  %v427_v31 = vsel %vm248_vm4, %v425_v28, %v423_v29  ;;  %1178 = vmatpush1.msk.msra.mxu1 %vm264_vm5, %v1283_v1  ;;  %601 = vmatprep.mubr.f32.mxu1 %v1237_v0 }
 0x107   : > { %1172 = vmatprep.subr.msk.mxu0 %vm264_vm5, %v426_v30  ;;  %1180 = vmatprep.subr.msk.mxu1 %vm264_vm5, %v231_v11  ;;  %v786_v34 = vpop.permute.xlu1 %785 }
 0x108   : > { %1173 = vmatpush1.msk.msra.mxu0 %vm264_vm5, %v427_v31 }
 0x109   : > { %v784_v35 = vpop.permute.xlu0 %783  ;;  %1174 = vmatmul.mubr.msk.f32.vlgmr.msra.gmra.mrb[0].mxu0 %vm260_vm6, %v1171_v32  ;;  %1179 = vmatmul.mubr.msk.f32.vlgmr.msra.gmra.mrb[2].mxu1 %vm260_vm6, %v1176_v33 }
 0x10a   : > { %v787_v36 = vsel %vm778_vm7, %v784_v35, %v786_v34  ;;  %v788_v37 = vsel %vm778_vm7, %v786_v34, %v784_v35  ;;  %1181 = vmatpush1.msk.msra.mxu1 %vm264_vm5, %v233_v12  ;;  %864 = vmatprep.mubr.f32.mxu0 %v1237_v0 }
 0x10b   : > { %1184 = vmatprep.subr.msk.mxu1 %vm264_vm5, %v243_v16  ;;  %1189 = vmatprep.subr.msk.mxu0 %vm264_vm5, %v788_v37  ;;  %v777_v39 = vpop.permute.xlu1 %776 }
 0x10c   : > { %1190 = vmatpush1.msk.msra.mxu0 %vm264_vm5, %v787_v36  ;;  %681 = vmatprep.mubr.f32.mxu1 %v1237_v0 }
 0x10d   : > { %v775_v40 = vpop.permute.xlu0 %774  ;;  %1191 = vmatmul.mubr.msk.f32.vlgmr.msra.gmra.mrb[2].mxu0 %vm260_vm6, %v1188_v38 }
 0x10e   : > { %v779_v41 = vsel %vm778_vm7, %v775_v40, %v777_v39  ;;  %v780_v42 = vsel %vm778_vm7, %v777_v39, %v775_v40  ;;  %944 = vmatprep.mubr.f32.mxu0 %v1237_v0 }
 0x10f   : > { %1192 = vmatprep.subr.msk.mxu0 %vm264_vm5, %v780_v42  ;;  %v954_v44 = vpop.permute.xlu1 %953 }
 0x110   : > { %1193 = vmatpush1.msk.msra.mxu0 %vm264_vm5, %v779_v41 }
 0x111   : > { %v952_v45 = vpop.permute.xlu0 %951  ;;  %1182 = vmatmul.mubr.msk.f32.vlgmr.msra.gmra.mrb[2].mxu1 %vm260_vm6, %v1175_v43 }
 0x112   : > { %v956_v46 = vsel %vm778_vm7, %v954_v44, %v952_v45  ;;  %1185 = vmatpush1.msk.msra.mxu1 %vm264_vm5, %v1299_v17  ;;  %763 = vmatprep.mubr.f32.mxu1 %v1237_v0  ;;  %v955_v48 = vsel %vm778_vm7, %v952_v45, %v954_v44 }
 0x113   : > { %1196 = vmatprep.subr.msk.mxu0 %vm264_vm5, %v956_v46 }
 0x115   : > { %1194 = vmatmul.mubr.msk.f32.vlgmr.msra.gmra.mrb[2].mxu0 %vm260_vm6, %v1187_v47 }
 0x116   : > { %1197 = vmatpush1.msk.msra.mxu0 %vm264_vm5, %v955_v48  ;;  %1032 = vmatprep.mubr.f32.mxu0 %v1237_v0 }
 0x119   : > { %1186 = vmatmul.mubr.msk.f32.vlgmr.msra.gmra.mrb[2].mxu1 %vm260_vm6, %v1183_v49 }
 0x11d   : > { %1198 = vmatmul.mubr.msk.f32.vlgmr.msra.gmra.mrb[2].mxu0 %vm260_vm6, %v1195_v50 }
 0x1d8   : > { %v337_v51 = vpop.f32.mrb[0].mxu1 }
 0x1d9   : > { %v339_v52 = vpop.f32.mrb[1].mxu1 }
 0x1dc   : > { %v505_v53 = vpop.f32.mrb[0].mxu0 }
 0x1dd   : > { %v1203_v54 = vadd.f32 %v505_v53, %v337_v51  ;;  %v507_v55 = vpop.f32.mrb[1].mxu0 }
 0x1de   : > { %v1204_v56 = vadd.f32 %v507_v55, %v339_v52 }
 0x1df   : > { %v524_v0 = vmul.f32 %v1203_v54, %v517_v61 }
 0x1e0   : > { %v525_v2 = vmul.f32 %v1204_v56, %v521_v62 }
 0x1ec   : > { %v765_v1 = vpop.f32.mrb[2].mxu1 }
 0x1ed   : > { %v772_v4 = vadd.f32 %v765_v1, %v524_v0  ;;  %v767_v5 = vpop.f32.mrb[3].mxu1 }
 0x1ee   : > { %v773_v3 = vadd.f32 %v767_v5, %v525_v2 }
 0x1f0   : > { %v1034_v8 = vpop.f32.mrb[2].mxu0 }
 0x1f1   : > { %v1054_v9 = vmul.f32 %v1047_v6, %v1034_v8  ;;  %v1036_v10 = vpop.f32.mrb[3].mxu0 }
 0x1f2   : > { %v1055_v11 = vmul.f32 %v1051_v7, %v1036_v10 }
 0x1f3   : > { %v1056_v12 = vadd.f32 %v1054_v9, %v772_v4 }
 0x1f4   : > { %v1057_v13 = vadd.f32 %v1055_v11, %v773_v3 }
 0x1f5   : > { %v1063_v14 = vmul.f32 %v1056_v12, %v1056_v12 }
 0x1f6   : > { %v1058_v15 = vadd.f32 %v1057_v13, %v1056_v12  ;;  %v1064_v16 = vmul.f32 %v1057_v13, %v1057_v13 }
 0x1f8   : > { %1059 = vadd.xlane.f32.xlu0 %v1058_v15  ;;  %v1065_v17 = vadd.f32 %v1064_v16, %v1063_v14 }
 0x1fa   : > { %1066 = vadd.xlane.f32.xlu1 %v1065_v17 }
 0x285   : > { %v1060_v18 = vpop.xlane.xlu0 %1059 }
 0x286   : > { %1062 = vst.msk [vmem:[%s202_s25] sm:$0xff] %vm1061_vm8, %v1060_v18 }
 0x287   : > { %v1067_v19 = vpop.xlane.xlu1 %1066 }
 0x288   : > { %1068 = vst.msk [vmem:[%s206_s28] sm:$0xff] %vm1061_vm8, %v1067_v19 }
 0x289 PF: > { %s15_s15 = sadd.s32 1, %s1235_s15  }
 0x28a   : > { %p12_p4 = scmp.ge.s32.totalorder %s15_s15, 4  }
 0x28c   :  { %14 = sbr.rel (!%p12_p4) target bundleno = 1 (0x1), region = 83 }

// kernel: simple_conv2d.3
= control target key start
LH: loop header
LB: loop body
LE: loop exit
PB: predicated region body
PF: predicated region fallthrough
CT: control target
= control target key end

     0   :  { %s1317_s23 = smov 0   ;;  %s1475_s0 = inlined_call_operand.vmem [shape: f32[2,4,256], index: 0, kind: input, shape index: {}]   ;;  %s1476_s1 = inlined_call_operand.vmem [shape: f32[9,8,4], index: 1, kind: input, shape index: {}]   ;;  %s1477_s2 = inlined_call_operand.vmem [shape: f32[2,256], index: 2, kind: input, shape index: {}]   ;;  %s1478_s3 = inlined_call_operand.vmem [shape: f32[8,1], index: 3, kind: input, shape index: {}]   ;;  %s1479_s4 = inlined_call_operand.vmem [shape: f32[8,1], index: 4, kind: input, shape index: {}]   ;;  %s1480_s5 = inlined_call_operand.<no memory space> [shape: f32[1,1], index: 5, kind: input, shape index: {}]   ;;  %s1481_s6 = inlined_call_operand.vmem [shape: f32[2,8,256], index: 6, kind: output, shape index: {}]  }
   0x1   :  { %11 = sst [smem:[#allocation2]] %s1480_s5 }
   0x2 LB: > { %s1185_s24 = sadd.s32 4294967295, %s1271_s23   ;;  %p1189_p0 = scmp.ge.s32.totalorder %s1271_s23, 1  ;;  %s1271_s23 = sphi %s1317_s23, %s17_s23  }
   0x3   : > { %p213_p1 = scmp.lt.s32.totalorder %s1271_s23, 3 }
   0x5   : > { %p214_p2 = pnand %p1189_p0, %p213_p1 }
   0x6   : > { %p243_p3 = scmp.lt.s32.totalorder (!%p214_p2), %s1185_s24, 1  ;;  %v1273_v0 = vmov (!%p214_p2), 0.0   ;;  %s1274_s28 = smov (!%p214_p2), 16   ;;  %v254_v3 = vlaneseq (!%p214_p2)  ;;  %v1278_v18 = vmov (!%p214_p2), 0   ;;  %v1112_v19 = vld [vmem:[%s1479_s4] sm:$0xff] (!%p214_p2)  ;;  %vm310_vm5 = vcmask (!%p214_p2), 1043456  }
   0x7   : > { %217 = sbr.rel (%p214_p2) target bundleno = 511 (0x1ff), region = 44  ;;  %461 = vmatprep.mubr.f32.mxu0 (!%p214_p2), %v1273_v0  ;;  %381 = vmatprep.mubr.f32.mxu1 (!%p214_p2), %v1273_v0  ;;  %s1275_s29 = smov (!%p214_p2), 112   ;;  %v1104_v20 = vld [vmem:[%s1478_s3] sm:$0xff] (!%p214_p2)  ;;  %vm306_vm6 = vcmask (!%p214_p2), 31744   ;;  %v1196_v30 = vld [vmem:[%s1476_s1 + $0x18] sm:$0xff] (!%p214_p2)  ;;  %v1203_v35 = vld [vmem:[%s1476_s1 + $0x30] sm:$0xff] (!%p214_p2) }
   0x8   : > { %v1344_v4 = vand.u32 (!%p214_p2), 127, %v254_v3  ;;  %s1276_s30 = smov (!%p214_p2), 1   ;;  %s1277_s7 = smov (!%p214_p2), 127   ;;  %1262 = vset.pattern.permute.xlu0 (!%p214_p2), %v1278_v18  ;;  %1263 = vset.pattern.permute.xlu1 (!%p214_p2), %v1278_v18  ;;  %v297_v25 = vld [vmem:[%s1476_s1] sm:$0xff] (!%p214_p2)  ;;  %v1220_v41 = vld [vmem:[%s1476_s1 + $0x28] sm:$0xff] (!%p214_p2)  ;;  %v1219_v50 = vld [vmem:[%s1476_s1 + $0x10] sm:$0xff] (!%p214_p2) }
   0x9   : > { %v1208_v36 = vld [vmem:[%s1476_s1 + $0x20] sm:$0xff] (!%p214_p2)  ;;  %v1207_v46 = vld [vmem:[%s1476_s1 + $0x8] sm:$0xff] (!%p214_p2)  ;;  %v1215_v52 = vld [vmem:[%s1476_s1 + $0x38] sm:$0xff] (!%p214_p2)  ;;  %v561_v60 = vshrl.u32 (!%p214_p2), %v254_v3, 7  ;;  %s1120_s11 = sld [smem:[#allocation2]] (!%p214_p2) }
   0xa   : > { %vm257_vm0 = vcmp.ge.s32.totalorder (!%p214_p2), %v1344_v4, 16  ;;  %vm276_vm1 = vcmp.lt.s32.totalorder (!%p214_p2), %v1344_v4, 16  ;;  %v256_v7 = vadd.s32 (!%p214_p2), 128, %v1344_v4  ;;  %vm285_vm3 = vcmp.lt.s32.totalorder (!%p214_p2), %v1344_v4, 112  ;;  %v1227_v53 = vld [vmem:[%s1476_s1 + $0x40] sm:$0xff] (!%p214_p2) }
   0xb   : > { %v1194_v8 = vsel (!%p214_p2), %vm257_vm0, 1.0, %v1273_v0  ;;  %vm294_vm4 = vcmp.lt.s32.totalorder (!%p214_p2), %v1344_v4, 1  ;;  %vm824_vm7 = vcmp.lt.s32.totalorder (!%p214_p2), %v1344_v4, 127  ;;  %v562_v61 = vsub.s32 (!%p214_p2), 0, %v561_v60 }
   0xc   : > { %vm264_vm2 = vcmp.lt.s32.totalorder (!%p214_p2), %v256_v7, 240  ;;  %v558_v62 = vld [vmem:[%s1477_s2] ss:$2 sm:$0x3] (!%p214_p2)  ;;  %v566_v63 = vsub.s32 (!%p214_p2), 1, %v561_v60 }
   0xd   : > { %v1195_v14 = vsel (!%p214_p2), %vm264_vm2, 1.0, %v1273_v0 }
   0xe   : > { %s1483_s24 = smov (!%p243_p3, %s1185_s24), 1 }
   0xf   : > { %s1234_s5 = sshll.u32 %s1483_s24, 3  ;;  %s1235_s12 = sshll.u32 %s1483_s24, 4 }
  0x10   : > { %s247_s27 = scalar_lea.vmem %s1475_s0, %s1234_s5  ;;  %s252_s15 = scalar_lea.vmem %s1481_s6, %s1235_s12 }
  0x11   : > { %v1333_v1 = vld [vmem:[%s247_s27] sm:$0xff] }
  0x12   : > { %272 = vrot.lane.b32.xlu0 %v1333_v1, %s1274_s28  ;;  %281 = vrot.lane.b32.xlu1 %v1333_v1, %s1275_s29  ;;  %v1339_v2 = vcombine.high %v1333_v1, %v1333_v1 }
  0x16   : > { %274 = vrot.lane.b32.xlu0 %v1339_v2, %s1274_s28  ;;  %283 = vrot.lane.b32.xlu1 %v1339_v2, %s1275_s29 }
  0x84   : > { %v273_v5 = vpop.permute.xlu0 %272  ;;  %v282_v6 = vpop.permute.xlu1 %281 }
  0x88   : > { %v275_v9 = vpop.permute.xlu0 %274  ;;  %v284_v13 = vpop.permute.xlu1 %283 }
  0x89   : > { %v278_v10 = vsel %vm276_vm1, %v275_v9, %v273_v5  ;;  %v277_v11 = vsel %vm276_vm1, %v273_v5, %v275_v9  ;;  %v287_v15 = vsel %vm285_vm3, %v284_v13, %v282_v6  ;;  %v1357_v17 = vsel %vm285_vm3, %v282_v6, %v284_v13 }
  0x8a   : > { %v1350_v12 = vmul.f32 %v1194_v8, %v278_v10  ;;  %292 = vrot.lane.b32.xlu1 %v277_v11, %s1276_s30  ;;  %v289_v16 = vmul.f32 %v1195_v14, %v287_v15 }
  0x8c   : > { %290 = vrot.lane.b32.xlu0 %v1350_v12, %s1276_s30 }
  0x8e   : > { %300 = vrot.lane.b32.xlu1 %v1339_v2, %s1276_s30 }
  0x90   : > { %298 = vrot.lane.b32.xlu0 %v1333_v1, %s1276_s30 }
  0x92   : > { %470 = vrot.lane.b32.xlu1 %v289_v16, %s1276_s30 }
  0x94   : > { %468 = vrot.lane.b32.xlu0 %v1357_v17, %s1276_s30 }
  0x96   : > { %831 = vrot.lane.b32.xlu1 %v1339_v2, %s1277_s7 }
  0x98   : > { %829 = vrot.lane.b32.xlu0 %v1333_v1, %s1277_s7 }
  0x9a   : > { %822 = vrot.lane.b32.xlu1 %v277_v11, %s1277_s7 }
  0x9c   : > { %820 = vrot.lane.b32.xlu0 %v1350_v12, %s1277_s7 }
  0x9e   : > { %999 = vrot.lane.b32.xlu1 %v289_v16, %s1277_s7 }
  0xa0   : > { %997 = vrot.lane.b32.xlu0 %v1357_v17, %s1277_s7 }
  0xa2   : > { %1115 = vperm.xlu1 %1263, %v1112_v19  }
  0xa4   : > { %1107 = vperm.xlu0 %1262, %v1104_v20  }
  0xfc   : > { %v293_v21 = vpop.permute.xlu1 %292 }
  0xfe   : > { %v291_v22 = vpop.permute.xlu0 %290 }
  0xff   : > { %v295_v23 = vsel %vm294_vm4, %v291_v22, %v293_v21  ;;  %v296_v24 = vsel %vm294_vm4, %v293_v21, %v291_v22  ;;  %v1123_v21 = vstv %s1120_s11 }
 0x100   : > { %1200 = vmatprep.subr.msk.mxu0 %vm310_vm5, %v295_v23  ;;  %v301_v26 = vpop.permute.xlu1 %300 }
 0x101   : > { %1201 = vmatpush1.msk.msra.mxu0 %vm310_vm5, %v296_v24 }
 0x102   : > { %v299_v27 = vpop.permute.xlu0 %298  ;;  %1202 = vmatmul.mubr.msk.f32.vlgmr.msra.gmra.mrb[0].mxu0 %vm306_vm6, %v297_v25 }
 0x103   : > { %v302_v28 = vsel %vm294_vm4, %v299_v27, %v301_v26  ;;  %v303_v29 = vsel %vm294_vm4, %v301_v26, %v299_v27  ;;  %549 = vmatprep.mubr.f32.mxu0 %v1273_v0 }
 0x104   : > { %1197 = vmatprep.subr.msk.mxu1 %vm310_vm5, %v302_v28  ;;  %v471_v31 = vpop.permute.xlu1 %470 }
 0x105   : > { %1198 = vmatpush1.msk.msra.mxu1 %vm310_vm5, %v303_v29 }
 0x106   : > { %v469_v32 = vpop.permute.xlu0 %468  ;;  %1199 = vmatmul.mubr.msk.f32.vlgmr.msra.gmra.mrb[0].mxu1 %vm306_vm6, %v1196_v30  ;;  %1209 = vmatprep.subr.msk.mxu1 %vm310_vm5, %v1339_v2  ;;  %v1231_v2 = vld [vmem:[%s1477_s2 + $0x1] ss:$2 sm:$0x3] }
 0x107   : > { %v472_v33 = vsel %vm294_vm4, %v469_v32, %v471_v31  ;;  %v473_v34 = vsel %vm294_vm4, %v471_v31, %v469_v32  ;;  %1210 = vmatpush1.msk.msra.mxu1 %vm310_vm5, %v1333_v1  ;;  %647 = vmatprep.mubr.f32.mxu1 %v1273_v0  ;;  %v567_v1 = vrot.slane %v558_v62, %v566_v63 }
 0x108   : > { %1204 = vmatprep.subr.msk.mxu0 %vm310_vm5, %v472_v33  ;;  %1212 = vmatprep.subr.msk.mxu1 %vm310_vm5, %v277_v11  ;;  %v832_v37 = vpop.permute.xlu1 %831  ;;  %v1093_v9 = vrot.slane %v1231_v2, %v562_v61  ;;  %v1097_v10 = vrot.slane %v1231_v2, %v566_v63 }
 0x109   : > { %1205 = vmatpush1.msk.msra.mxu0 %vm310_vm5, %v473_v34 }
 0x10a   : > { %v830_v38 = vpop.permute.xlu0 %829  ;;  %1206 = vmatmul.mubr.msk.f32.vlgmr.msra.gmra.mrb[0].mxu0 %vm306_vm6, %v1203_v35  ;;  %1211 = vmatmul.mubr.msk.f32.vlgmr.msra.gmra.mrb[2].mxu1 %vm306_vm6, %v1208_v36 }
 0x10b   : > { %v833_v39 = vsel %vm824_vm7, %v830_v38, %v832_v37  ;;  %v834_v40 = vsel %vm824_vm7, %v832_v37, %v830_v38  ;;  %1213 = vmatpush1.msk.msra.mxu1 %vm310_vm5, %v1350_v12  ;;  %910 = vmatprep.mubr.f32.mxu0 %v1273_v0 }
 0x10c   : > { %1216 = vmatprep.subr.msk.mxu1 %vm310_vm5, %v289_v16  ;;  %1221 = vmatprep.subr.msk.mxu0 %vm310_vm5, %v834_v40  ;;  %v823_v42 = vpop.permute.xlu1 %822 }
 0x10d   : > { %1222 = vmatpush1.msk.msra.mxu0 %vm310_vm5, %v833_v39  ;;  %727 = vmatprep.mubr.f32.mxu1 %v1273_v0 }
 0x10e   : > { %v821_v43 = vpop.permute.xlu0 %820  ;;  %1223 = vmatmul.mubr.msk.f32.vlgmr.msra.gmra.mrb[2].mxu0 %vm306_vm6, %v1220_v41 }
 0x10f   : > { %v825_v44 = vsel %vm824_vm7, %v821_v43, %v823_v42  ;;  %v826_v45 = vsel %vm824_vm7, %v823_v42, %v821_v43  ;;  %990 = vmatprep.mubr.f32.mxu0 %v1273_v0 }
 0x110   : > { %1224 = vmatprep.subr.msk.mxu0 %vm310_vm5, %v826_v45  ;;  %v1000_v47 = vpop.permute.xlu1 %999 }
 0x111   : > { %1225 = vmatpush1.msk.msra.mxu0 %vm310_vm5, %v825_v44 }
 0x112   : > { %v998_v48 = vpop.permute.xlu0 %997  ;;  %1214 = vmatmul.mubr.msk.f32.vlgmr.msra.gmra.mrb[2].mxu1 %vm306_vm6, %v1207_v46 }
 0x113   : > { %v1002_v49 = vsel %vm824_vm7, %v1000_v47, %v998_v48  ;;  %1217 = vmatpush1.msk.msra.mxu1 %vm310_vm5, %v1357_v17  ;;  %809 = vmatprep.mubr.f32.mxu1 %v1273_v0  ;;  %v1001_v51 = vsel %vm824_vm7, %v998_v48, %v1000_v47 }
 0x114   : > { %1228 = vmatprep.subr.msk.mxu0 %vm310_vm5, %v1002_v49 }
 0x116   : > { %1226 = vmatmul.mubr.msk.f32.vlgmr.msra.gmra.mrb[2].mxu0 %vm306_vm6, %v1219_v50 }
 0x117   : > { %1229 = vmatpush1.msk.msra.mxu0 %vm310_vm5, %v1001_v51  ;;  %1078 = vmatprep.mubr.f32.mxu0 %v1273_v0  ;;  %v563_v0 = vrot.slane %v558_v62, %v562_v61 }
 0x11a   : > { %1218 = vmatmul.mubr.msk.f32.vlgmr.msra.gmra.mrb[2].mxu1 %vm306_vm6, %v1215_v52 }
 0x11e   : > { %1230 = vmatmul.mubr.msk.f32.vlgmr.msra.gmra.mrb[2].mxu0 %vm306_vm6, %v1227_v53 }
 0x121   : > { %v1116_v18 = vpop.permute.xlu1 %1115 }
 0x123   : > { %v1108_v15 = vpop.permute.xlu0 %1107 }
 0x1d9   : > { %v383_v54 = vpop.f32.mrb[0].mxu1 }
 0x1da   : > { %v385_v55 = vpop.f32.mrb[1].mxu1 }
 0x1dd   : > { %v551_v56 = vpop.f32.mrb[0].mxu0 }
 0x1de   : > { %v1236_v57 = vadd.f32 %v551_v56, %v383_v54  ;;  %v553_v58 = vpop.f32.mrb[1].mxu0 }
 0x1df   : > { %v1237_v59 = vadd.f32 %v553_v58, %v385_v55 }
 0x1e0   : > { %v570_v4 = vmul.f32 %v1236_v57, %v563_v0 }
 0x1e1   : > { %v571_v6 = vmul.f32 %v1237_v59, %v567_v1 }
 0x1ed   : > { %v811_v5 = vpop.f32.mrb[2].mxu1 }
 0x1ee   : > { %v818_v7 = vadd.f32 %v811_v5, %v570_v4  ;;  %v813_v8 = vpop.f32.mrb[3].mxu1 }
 0x1ef   : > { %v819_v3 = vadd.f32 %v813_v8, %v571_v6 }
 0x1f1   : > { %v1080_v11 = vpop.f32.mrb[2].mxu0 }
 0x1f2   : > { %v1100_v12 = vmul.f32 %v1093_v9, %v1080_v11  ;;  %v1082_v13 = vpop.f32.mrb[3].mxu0 }
 0x1f3   : > { %v1101_v14 = vmul.f32 %v1097_v10, %v1082_v13 }
 0x1f4   : > { %v1102_v16 = vadd.f32 %v1100_v12, %v818_v7 }
 0x1f5   : > { %v1103_v17 = vadd.f32 %v1101_v14, %v819_v3 }
 0x1f6   : > { %v1110_v19 = vmul.f32 %v1108_v15, %v1102_v16 }
 0x1f7   : > { %v1111_v20 = vmul.f32 %v1108_v15, %v1103_v17 }
 0x1f8   : > { %v1118_v22 = vadd.f32 %v1116_v18, %v1110_v19 }
 0x1f9   : > { %v1119_v23 = vadd.f32 %v1116_v18, %v1111_v20 }
 0x1fa   : > { %vm1121_vm8 = vcmp.ge.f32.partialorder %v1118_v22, 0.0  ;;  %v1124_v24 = vmul.f32 %v1123_v21, %v1118_v22 }
 0x1fb   : > { %vm1122_vm9 = vcmp.ge.f32.partialorder %v1119_v23, 0.0  ;;  %v1125_v25 = vmul.f32 %v1123_v21, %v1119_v23 }
 0x1fc   : > { %v1126_v26 = vsel %vm1121_vm8, %v1118_v22, %v1124_v24 }
 0x1fd   : > { %v1127_v27 = vsel %vm1122_vm9, %v1119_v23, %v1125_v25  ;;  %1128 = vst [vmem:[%s252_s15] sm:$0xff] %v1126_v26 }
 0x1fe   : > { %1129 = vst [vmem:[%s252_s15 + $0x8] sm:$0xff] %v1127_v27 }
 0x1ff PF: > { %s17_s23 = sadd.s32 1, %s1271_s23  }
 0x200   : > { %p14_p4 = scmp.ge.s32.totalorder %s17_s23, 4  }
 0x202   :  { %16 = sbr.rel (!%p14_p4) target bundleno = 2 (0x2), region = 83 }

</bundles_post_ra>
